<compile_context>
chip_gen: v5e
topology: v5e:2x2
jax: 0.10.0
libtpu: 0.0.40
codegen_flags: <defaults>
</compile_context>

<pallas_src>
import functools
import math

import jax
import jax.numpy as jnp
from jax.experimental import pallas as pl
from jax.experimental.pallas import tpu as pltpu


# ----------------------------------------------------------------------------- helpers
def _round_up(x: int, m: int) -> int:
    return (x + m - 1) // m * m


def _balanced_tile(size: int, cap: int, align: int):
    """Largest tile <= cap (multiple of `align`) minimizing total padding.

    Returns (tile, padded_size) with padded_size % tile == 0.
    """
    size_a = _round_up(max(int(size), 1), align)
    cap = max(align, (cap // align) * align)
    n = max(1, math.ceil(size_a / cap))
    t = _round_up(math.ceil(size_a / n), align)
    return t, n * t


def _tpu_vmem_and_cores():
    """Best-effort query: per-core VMEM bytes and TensorCores per chip."""
    vmem = 64 << 20   # conservative default = v7x per-TC VMEM
    cores = 1
    try:
        info = pltpu.get_tpu_info()
        vmem = int(getattr(info, "vmem_capacity_bytes", vmem))
        for name in ("num_cores", "tensorcores_per_chip", "num_tensorcores",
                     "core_count"):
            v = getattr(info, name, None)
            if v:
                cores = max(1, min(int(v), 8))
                break
    except Exception:
        pass
    if cores == 1:
        try:
            kind = str(getattr(jax.devices()[0], "device_kind", "")).lower()
            if "v7" in kind:
                cores = 2
        except Exception:
            pass
    return vmem, cores


# ----------------------------------------------------------------------------- kernels
def _linear_onepass_kernel(x_ref, w_ref, b_ref, o_ref):
    """Whole K in one MXU pass: x:(tm,Kp) @ w:(Kp,tn) + b, f32 accumulation."""
    o_ref[...] = (
        jnp.dot(x_ref[...], w_ref[...], preferred_element_type=jnp.float32)
        + b_ref[...]
    ).astype(o_ref.dtype)


def _linear_acc_kernel(x_ref, w_ref, b_ref, o_ref, acc_ref):
    """K tiled on grid axis 2; f32 VMEM accumulator; bias added once at finalize."""
    k = pl.program_id(2)

    @pl.when(k == 0)
    def _():
        acc_ref[...] = jnp.zeros_like(acc_ref)

    # W is K-major (tk, tn): standard contraction, no per-step RHS transpose.
    acc_ref[...] += jnp.dot(x_ref[...], w_ref[...],
                            preferred_element_type=jnp.float32)

    @pl.when(k == pl.num_programs(2) - 1)
    def _():
        o_ref[...] = (acc_ref[...] + b_ref[...]).astype(o_ref.dtype)


# ----------------------------------------------------------------------------- launcher
@functools.partial(
    jax.jit,
    static_argnames=("tm", "tn", "tk", "mp", "out_features", "vmem_limit"))
def _linear_pallas(x2d, w_p, b_p, *, tm, tn, tk, mp, out_features, vmem_limit):
    B, IN = x2d.shape
    Kp, Np = w_p.shape
    Mp = mp
    out_dtype = x2d.dtype            # output matches the caller's activation dtype

    x_p = x2d
    if x_p.dtype != w_p.dtype:       # optional bf16 compute path
        x_p = x_p.astype(w_p.dtype)
    if Mp != B or Kp != IN:
        x_p = jnp.pad(x_p, ((0, Mp - B), (0, Kp - IN)))

    nm, nn, nk = Mp // tm, Np // tn, Kp // tk

    itemsize = w_p.dtype.itemsize
    out_itemsize = jnp.dtype(out_dtype).itemsize
    cost = pl.CostEstimate(
        flops=2 * Mp * Np * Kp,
        transcendentals=0,
        # x is streamed once per N tile, W (and bias) once per M tile.
        bytes_accessed=(Mp * Kp * nn * itemsize
                        + Kp * Np * nm * itemsize
                        + Np * nm * b_p.dtype.itemsize
                        + Mp * Np * out_itemsize),
    )

    if nk == 1:
        # Collapsed-K plan: one long MXU pass per output tile, no scratch.
        y_p = pl.pallas_call(
            _linear_onepass_kernel,
            out_shape=jax.ShapeDtypeStruct((Mp, Np), out_dtype),
            grid_spec=pltpu.PrefetchScalarGridSpec(
                num_scalar_prefetch=0,
                grid=(nm, nn),
                in_specs=[
                    pl.BlockSpec((tm, tk), lambda i, j: (i, 0)),   # x (tm, Kp)
                    pl.BlockSpec((tk, tn), lambda i, j: (0, j)),   # W (Kp, tn)
                    pl.BlockSpec((1, tn), lambda i, j: (0, j)),    # bias
                ],
                out_specs=pl.BlockSpec((tm, tn), lambda i, j: (i, j)),
            ),
            compiler_params=pltpu.CompilerParams(
                dimension_semantics=("parallel", "parallel"),
                vmem_limit_bytes=vmem_limit,
            ),
            cost_estimate=cost,
        )(x_p, w_p, b_p)
    else:
        y_p = pl.pallas_call(
            _linear_acc_kernel,
            out_shape=jax.ShapeDtypeStruct((Mp, Np), out_dtype),
            grid_spec=pltpu.PrefetchScalarGridSpec(
                num_scalar_prefetch=0,
                grid=(nm, nn, nk),
                in_specs=[
                    pl.BlockSpec((tm, tk), lambda i, j, k: (i, k)),  # x
                    pl.BlockSpec((tk, tn), lambda i, j, k: (k, j)),  # W (K-major)
                    pl.BlockSpec((1, tn), lambda i, j, k: (0, j)),   # bias
                ],
                out_specs=pl.BlockSpec((tm, tn), lambda i, j, k: (i, j)),
                scratch_shapes=[pltpu.VMEM((tm, tn), jnp.float32)],
            ),
            compiler_params=pltpu.CompilerParams(
                dimension_semantics=("parallel", "parallel", "arbitrary"),
                vmem_limit_bytes=vmem_limit,
            ),
            cost_estimate=cost,
        )(x_p, w_p, b_p)

    return y_p[:B, :out_features]


# ----------------------------------------------------------------------------- module
class MetaHead:
    """Pallas-TPU equivalent of the PyTorch Meta_head module (one nn.Linear).

    y = x @ weight.T + bias   with weight: (OUT, IN), bias: (OUT,), x: (..., IN).
    """

    _TM_CAP = 512
    _TN_CAP = 512

    def __init__(self, weight, bias, *, compute_dtype=None, tk_cap=None):
        weight = jnp.asarray(weight)
        bias = jnp.asarray(bias)
        self.out_features, self.in_features = weight.shape
        self.compute_dtype = (jnp.dtype(compute_dtype) if compute_dtype is not None
                              else jnp.dtype(weight.dtype))
        itemsize = self.compute_dtype.itemsize
        self._m_align = 16 if itemsize < 4 else 8

        vmem_cap, num_cores = _tpu_vmem_and_cores()
        self._vmem_cap = vmem_cap

        # ---- N (output-feature) tiling: lane-aligned (128); on multi-TC chips
        # split N so >= num_cores parallel blocks exist even when Mp == tm.
        tn, Np = _balanced_tile(self.out_features, self._TN_CAP, 128)
        if num_cores >= 2 and Np // tn < num_cores and Np >= num_cores * 128:
            target_cap = max(128, ((Np // num_cores) // 128) * 128)
            tn, Np = _balanced_tile(self.out_features, target_cap, 128)

        # ---- K (reduction) tiling: chip-aware.  Collapse K entirely when the
        # single-pass footprint fits ~40% of this chip's VMEM; otherwise pick
        # the largest lane-aligned tk the budget allows.
        budget = int(0.4 * vmem_cap)
        fixed = 2 * self._TM_CAP * tn * 4 + self._TM_CAP * tn * 4   # out dbl-buf + f32 acc
        per_k = 2 * (self._TM_CAP + tn) * itemsize                   # x + W, double-buffered
        auto_tk_cap = max(128, (((budget - fixed) // per_k) // 128) * 128)
        cap = _round_up(int(tk_cap), 128) if tk_cap is not None else auto_tk_cap
        tk, Kp = _balanced_tile(self.in_features, cap, 128)

        self.tn, self.Np, self.tk, self.Kp = tn, Np, tk, Kp

        # ---- Weight/bias prep hoisted out of the per-call path.  W is stored
        # K-major (Kp, Np): transpose fused with the one-time pad.  Bias kept
        # in f32 (it is added to the f32 accumulator).
        OUT, IN = self.out_features, self.in_features
        self.w_p = jnp.pad(weight.astype(self.compute_dtype).T,
                           ((0, Kp - IN), (0, Np - OUT)))
        self.b_p = jnp.pad(bias.astype(jnp.float32), (0, Np - OUT)).reshape(1, Np)

    def __call__(self, x):
        x = jnp.asarray(x)
        orig_shape = x.shape
        x2d = x.reshape(-1, self.in_features)
        B = x2d.shape[0]

        # Balanced M tiling (minimizes pad rows: B=300 -> Mp=304, not 512).
        tm, Mp = _balanced_tile(B, self._TM_CAP, self._m_align)

        # VMEM limit from the actual double-buffered footprint, capped below
        # physical capacity (v7x-safe), never the full chip VMEM.
        itemsize = self.compute_dtype.itemsize
        out_itemsize = jnp.dtype(x.dtype).itemsize
        nk = self.Kp // self.tk
        footprint = (2 * (tm * self.tk + self.tk * self.tn) * itemsize
                     + 2 * tm * self.tn * out_itemsize
                     + 2 * self.Np * 4
                     + (tm * self.tn * 4 if nk > 1 else 0))
        vmem_limit = int(min(max(footprint * 5 // 4 + (2 << 20), 16 << 20),
                             self._vmem_cap * 3 // 4))

        y2d = _linear_pallas(
            x2d, self.w_p, self.b_p,
            tm=tm, tn=self.tn, tk=self.tk, mp=Mp,
            out_features=self.out_features, vmem_limit=vmem_limit)
        return y2d.reshape(*orig_shape[:-1], self.out_features)


# ----------------------------------------------------------------------------- self-test
if __name__ == "__main__":
    key = jax.random.PRNGKey(0)

    def make_params(k, out_f, in_f):
        kw, kb = jax.random.split(k)
        bound = 1.0 / (in_f ** 0.5)
        w = jax.random.uniform(kw, (out_f, in_f), jnp.float32, -bound, bound)
        b = jax.random.uniform(kb, (out_f,), jnp.float32, -bound, bound)
        return w, b

    # --- Case 1: toy Meta_head(32, 16), batch 8 (single tile, collapsed K). ---
    k1, k1x, key = jax.random.split(key, 3)
    w1, b1 = make_params(k1, 16, 32)
    x1 = jax.random.normal(k1x, (8, 32), jnp.float32)
    head1 = MetaHead(w1, b1)
    y1 = head1(x1)
    jax.block_until_ready(y1)
    assert y1.shape == (8, 16)
    assert jnp.allclose(y1, x1 @ w1.T + b1, atol=1e-5, rtol=1e-5)

    # Same head on a leading-batched input (..., IN) like nn.Linear.
    y1b = head1(x1.reshape(2, 4, 32))
    jax.block_until_ready(y1b)
    assert y1b.shape == (2, 4, 16)
    assert jnp.allclose(y1b.reshape(8, 16), y1, atol=1e-6, rtol=1e-6)

    # --- Case 2: ragged shapes (pad on every axis, single-pass K). -----------
    k2, k2x, key = jax.random.split(key, 3)
    w2, b2 = make_params(k2, 136, 200)
    x2 = jax.random.normal(k2x, (300, 200), jnp.float32)
    y2 = MetaHead(w2, b2)(x2)
    jax.block_until_ready(y2)
    assert y2.shape == (300, 136)
    assert jnp.allclose(y2, x2 @ w2.T + b2, atol=1e-4, rtol=1e-4)

    # --- Case 3: force the multi-K accumulator path (small tk override). -----
    k3, k3x, key = jax.random.split(key, 3)
    w3, b3 = make_params(k3, 136, 384)
    x3 = jax.random.normal(k3x, (300, 384), jnp.float32)
    y3 = MetaHead(w3, b3, tk_cap=128)(x3)   # Kp=384, tk=128 -> 3 K steps
    jax.block_until_ready(y3)
    assert y3.shape == (300, 136)
    assert jnp.allclose(y3, x3 @ w3.T + b3, atol=1e-4, rtol=1e-4)

    # --- Case 4: bf16 compute path (f32 accumulation, f32 output). -----------
    y4 = MetaHead(w2, b2, compute_dtype=jnp.bfloat16)(x2)
    jax.block_until_ready(y4)
    assert y4.shape == (300, 136)
    assert y4.dtype == jnp.float32
    assert jnp.allclose(y4, x2 @ w2.T + b2, atol=2e-2, rtol=2e-2)

    print("KERNEL_OK")
</pallas_src>

<mosaic_0001>
module attributes {stable_mosaic.version = 11 : i64} {
  func.func @_linear_onepass_kernel(%arg0: i32, %arg1: i32, %arg2: memref<8x128xf32, #tpu.memory_space<vmem>>, %arg3: memref<128x128xf32, #tpu.memory_space<vmem>>, %arg4: memref<1x128xf32, #tpu.memory_space<vmem>>, %arg5: memref<8x128xf32, #tpu.memory_space<vmem>>) attributes {dimension_semantics = [#tpu.dimension_semantics<parallel>, #tpu.dimension_semantics<parallel>], iteration_bounds = array<i64: 1, 1>, scalar_prefetch = 0 : i64, scratch_operands = 0 : i64, tpu.core_type = #tpu.core_type<tc>, window_params = [{transform_indices = @transform_0, window_bounds = array<i64: 8, 128>}, {transform_indices = @transform_1, window_bounds = array<i64: 128, 128>}, {transform_indices = @transform_2, window_bounds = array<i64: 1, 128>}, {transform_indices = @transform_3, window_bounds = array<i64: 8, 128>}]} {
    %c0 = arith.constant 0 : index
    %c0_0 = arith.constant 0 : index
    %0 = vector.load %arg2[%c0, %c0_0] : memref<8x128xf32, #tpu.memory_space<vmem>>, vector<8x128xf32>
    %c0_1 = arith.constant 0 : index
    %c0_2 = arith.constant 0 : index
    %1 = vector.load %arg3[%c0_1, %c0_2] : memref<128x128xf32, #tpu.memory_space<vmem>>, vector<128x128xf32>
    %cst = arith.constant dense<0.000000e+00> : vector<8x128xf32>
    %2 = tpu.matmul %0, %1, %cst {dimension_numbers = #tpu.dot_dimension_numbers<[1], [0], [0], [1], [0, 0, 1, 1], [], []>} : vector<8x128xf32>, vector<128x128xf32>, vector<8x128xf32> -> vector<8x128xf32>
    %c0_3 = arith.constant 0 : index
    %c0_4 = arith.constant 0 : index
    %3 = vector.load %arg4[%c0_3, %c0_4] : memref<1x128xf32, #tpu.memory_space<vmem>>, vector<1x128xf32>
    %4 = vector.broadcast %3 : vector<1x128xf32> to vector<8x128xf32>
    %5 = arith.addf %2, %4 : vector<8x128xf32>
    %c0_5 = arith.constant 0 : index
    %c0_6 = arith.constant 0 : index
    %6 = vector.load %arg5[%c0_5, %c0_6] : memref<8x128xf32, #tpu.memory_space<vmem>>, vector<8x128xf32>
    tpu.vector_store %arg5[%c0_5, %c0_6], %5 {strides = array<i32>} : memref<8x128xf32, #tpu.memory_space<vmem>>, vector<8x128xf32>,
    return
  }
  func.func @transform_0(%arg0: i32, %arg1: i32) -> (i32, i32) {
    %c0_i32 = arith.constant 0 : i32
    %c0_i32_0 = arith.constant 0 : i32
    return %arg0, %c0_i32 : i32, i32
  }
  func.func @transform_1(%arg0: i32, %arg1: i32) -> (i32, i32) {
    %c0_i32 = arith.constant 0 : i32
    %c0_i32_0 = arith.constant 0 : i32
    return %c0_i32, %arg1 : i32, i32
  }
  func.func @transform_2(%arg0: i32, %arg1: i32) -> (i32, i32) {
    %c0_i32 = arith.constant 0 : i32
    %c0_i32_0 = arith.constant 0 : i32
    return %c0_i32, %arg1 : i32, i32
  }
  func.func @transform_3(%arg0: i32, %arg1: i32) -> (i32, i32) {
    %c0_i32 = arith.constant 0 : i32
    return %arg0, %arg1 : i32, i32
  }
}

</mosaic_0001>

<bundles_post_ra>
// kernel: _linear_pallas.1
= control target key start
LH: loop header
LB: loop body
LE: loop exit
PB: predicated region body
PF: predicated region fallthrough
CT: control target
= control target key end

     0   :  { %8 = vsyncpa [#allocation3], 0  ;;  %s183_s0 = inlined_call_operand.vmem [shape: f32[8,128], index: 0, kind: input, shape index: {}]   ;;  %s184_s1 = inlined_call_operand.hbm [shape: f32[128,128], index: 1, kind: input, shape index: {}]   ;;  %s185_s2 = inlined_call_operand.vmem [shape: f32[1,128], index: 2, kind: input, shape index: {}]   ;;  %s186_s3 = inlined_call_operand.hbm [shape: f32[8,128], index: 3, kind: output, shape index: {}]  }
   0x1   :  { %9 = vsyncpa [#allocation4], 0  ;;  %s16_s14 = sshll.u32 %s184_s1, 4  ;;  %s147_s15 = smov [#allocation2]   ;;  %s17_s14 = int_to_ptr.hbm [resolvable:$true] %s16_s14 }
   0x2   :  { %s18_s16 = sshll.u32 %s147_s15, 4  ;;  %s148_s17 = smov 128   ;;  %s19_s16 = int_to_ptr.vmem [resolvable:$true] %s18_s16 }
   0x3   :  { %s149_s18 = smov 8  }
   0x4   :  { %24 = dma.hbm_to_vmem [thread:$0]  %s17_s14, 2048, %s19_s16, [#allocation3], %s148_s17, %s148_s17, %s149_s18  }
   0x5   :  { %143 = dma.done.wait [#allocation3], 2048  }
   0x6   :  { %144 = vsyncadd [#allocation3], 4294965248  ;;  %v47_v0 = vld [vmem:[#allocation2 + $0x78] sm:$0xff]  ;;  %v46_v1 = vld [vmem:[#allocation2 + $0x70] sm:$0xff]  ;;  %s150_s22 = smov [#allocation5]   ;;  %s80_s26 = sshll.u32 %s186_s3, 4  ;;  %s81_s26 = int_to_ptr.hbm [resolvable:$true] %s80_s26 }
   0x7   :  { %52 = vmatpush.msra.mxu0 %v47_v0  ;;  %v45_v2 = vld [vmem:[#allocation2 + $0x68] sm:$0xff]  ;;  %v44_v3 = vld [vmem:[#allocation2 + $0x60] sm:$0xff]  ;;  %v43_v4 = vld [vmem:[#allocation2 + $0x58] sm:$0xff]  ;;  %s78_s23 = sshll.u32 %s150_s22, 4  ;;  %s79_s23 = int_to_ptr.vmem [resolvable:$true] %s78_s23 }
   0x8   :  { %v42_v5 = vld [vmem:[#allocation2 + $0x50] sm:$0xff]  ;;  %v41_v6 = vld [vmem:[#allocation2 + $0x48] sm:$0xff]  ;;  %v40_v7 = vld [vmem:[#allocation2 + $0x40] sm:$0xff] }
   0x9   :  { %53 = vmatpush.msra.mxu0 %v46_v1  ;;  %v39_v8 = vld [vmem:[#allocation2 + $0x38] sm:$0xff]  ;;  %v38_v9 = vld [vmem:[#allocation2 + $0x30] sm:$0xff]  ;;  %v37_v10 = vld [vmem:[#allocation2 + $0x28] sm:$0xff] }
   0xa   :  { %v36_v11 = vld [vmem:[#allocation2 + $0x20] sm:$0xff]  ;;  %v35_v12 = vld [vmem:[#allocation2 + $0x18] sm:$0xff]  ;;  %v34_v13 = vld [vmem:[#allocation2 + $0x10] sm:$0xff] }
   0xb   :  { %54 = vmatpush.msra.mxu0 %v45_v2  ;;  %v33_v14 = vld [vmem:[#allocation2 + $0x8] sm:$0xff]  ;;  %v32_v15 = vld [vmem:[#allocation2] sm:$0xff] }
   0xc   :  { %v31_v16 = vld [vmem:[%s183_s0] sm:$0xff] }
   0xd   :  { %55 = vmatpush.msra.mxu0 %v44_v3  ;;  %v94_v17 = vld [vmem:[%s185_s2] ss:$0 sm:$0xff] }
   0xf   :  { %56 = vmatpush.msra.mxu0 %v43_v4 }
  0x11   :  { %57 = vmatpush.msra.mxu0 %v42_v5 }
  0x13   :  { %58 = vmatpush.msra.mxu0 %v41_v6 }
  0x15   :  { %59 = vmatpush.msra.mxu0 %v40_v7 }
  0x17   :  { %60 = vmatpush.msra.mxu0 %v39_v8 }
  0x19   :  { %61 = vmatpush.msra.mxu0 %v38_v9 }
  0x1b   :  { %62 = vmatpush.msra.mxu0 %v37_v10 }
  0x1d   :  { %63 = vmatpush.msra.mxu0 %v36_v11 }
  0x1f   :  { %64 = vmatpush.msra.mxu0 %v35_v12 }
  0x21   :  { %65 = vmatpush.msra.mxu0 %v34_v13 }
  0x23   :  { %66 = vmatpush.msra.mxu0 %v33_v14 }
  0x25   :  { %67 = vmatpush.msra.mxu0 %v32_v15 }
  0x26   :  { %68 = vmatmul.f32.vlgmr.msra.gmra.mxu0 %v31_v16 }
  0xa3   :  { %v69_v18 = vpop.f32.mrf.mxu0 }
  0xa4   :  { %v70_v19 = vadd.f32 %v94_v17, %v69_v18 }
  0xa6   :  { %72 = vst [vmem:[#allocation5] sm:$0xff] %v70_v19 }
  0xa7   :  { %83 = dma.vmem_to_hbm [thread:$0]  %s79_s23, 128, %s81_s26, [#allocation4]  }
  0xa8   :  { %145 = dma.done.wait [#allocation4], 128  }
  0xa9   :  { %146 = vsyncadd [#allocation4], 4294967168 }
  0xaa   :  { %88 = vsyncpa [#allocation3], 1 }
  0xab   :  { %89 = vsyncpa [#allocation4], 1 }

</bundles_post_ra>
